<compile_context>
chip_gen: v7x
topology: tpu7x:2x2x1
jax: 0.10.0
libtpu: 0.0.40
codegen_flags: <defaults>
</compile_context>

<pallas_src>
import functools

import jax
import jax.numpy as jnp
from jax import lax
from jax.experimental import pallas as pl
from jax.experimental.pallas import tpu as pltpu


def _lol_embeddings_kernel(idx_ref, word_ref, pos_lut_ref, out_ref):
    rows = idx_ref.shape[0]          # B * S
    V = word_ref.shape[0]            # vocab size (== 128, one lane tile)
    P = pos_lut_ref.shape[0]         # prod(axial_pos_shape) (== 64)

    idx = idx_ref[...]               # (rows, 2) int32: [token_id, position_id]
    ids = idx[:, 0:1]                # (rows, 1)
    pids = idx[:, 1:2]               # (rows, 1)

    # Word-embedding gather as a lane-aligned one-hot MXU matmul (K = V = 128).
    iota_w = lax.broadcasted_iota(jnp.int32, (rows, V), 1)
    oh_w = (iota_w == ids).astype(jnp.float32)
    word = jnp.dot(oh_w, word_ref[...], preferred_element_type=jnp.float32)

    # Axial positional embedding via the precomputed 64x128 LUT (K = 64).
    iota_p = lax.broadcasted_iota(jnp.int32, (rows, P), 1)
    oh_p = (iota_p == pids).astype(jnp.float32)
    pos = jnp.dot(oh_p, pos_lut_ref[...], preferred_element_type=jnp.float32)

    out_ref[...] = (word + pos).astype(out_ref.dtype)

    # TODO(synk): dropout omitted — hidden_dropout_prob=0.0 / eval mode (identity);
    # the non-axial PositionEmbeddings path is not implemented for this config.


def build_pos_lut(w0, w1):
    """Init-time (once-per-weights) positional LUT:
    pos_lut[p] = concat(w0[p // ax1], w1[p % ax1]), shape (ax0*ax1, H)."""
    ax0, _ = w0.shape
    ax1, _ = w1.shape
    pos = jnp.arange(ax0 * ax1, dtype=jnp.int32)
    return jnp.concatenate(
        [w0[pos // ax1], w1[pos % ax1]], axis=-1).astype(jnp.float32)


@functools.partial(jax.jit, static_argnames=())
def lol_embeddings_apply(input_ids, position_ids, word_table, pos_lut):
    B, S = input_ids.shape
    V, H = word_table.shape
    P = pos_lut.shape[0]
    rows = B * S

    # Single merged int32 index array: one small DMA instead of two.
    idx = jnp.stack(
        [input_ids.reshape(rows), position_ids.reshape(rows)],
        axis=-1).astype(jnp.int32)                       # (rows, 2)

    flops = 2.0 * rows * (V + P) * H
    bytes_accessed = (rows * 2 * 4) + (V * H * 4) + (P * H * 4) + (rows * H * 4)

    out_flat = pl.pallas_call(
        _lol_embeddings_kernel,
        out_shape=jax.ShapeDtypeStruct((rows, H), jnp.float32),
        in_specs=[
            pl.BlockSpec(memory_space=pltpu.MemorySpace.VMEM),   # idx      (rows, 2)
            pl.BlockSpec(memory_space=pltpu.MemorySpace.VMEM),   # word     (V, H)
            pl.BlockSpec(memory_space=pltpu.MemorySpace.VMEM),   # pos_lut  (P, H)
        ],
        out_specs=pl.BlockSpec(memory_space=pltpu.MemorySpace.VMEM),
        cost_estimate=pl.CostEstimate(
            flops=int(flops), transcendentals=0,
            bytes_accessed=int(bytes_accessed)),
    )(idx, word_table.astype(jnp.float32), pos_lut)

    return out_flat.reshape(B, S, H)


def lol_embeddings(input_ids, position_ids, word_table, w0, w1):
    """Convenience wrapper: builds the (normally cached) pos LUT and applies."""
    pos_lut = build_pos_lut(w0, w1)   # in real use: build once at init and reuse
    return lol_embeddings_apply(input_ids, position_ids, word_table, pos_lut)


if __name__ == "__main__":
    # ---- config ----
    vocab_size = 128
    hidden_size = 128
    axial_pos_shape = (8, 8)
    axial_pos_embds_dim = (32, 96)
    max_position_embeddings = 512
    B, S = 2, axial_pos_shape[0] * axial_pos_shape[1]
    assert sum(axial_pos_embds_dim) == hidden_size
    assert S <= max_position_embeddings

    key = jax.random.PRNGKey(0)
    k_ids, k_emb, k_w0, k_w1 = jax.random.split(key, 4)

    # ---- deterministic parameters ----
    # (nn.Embedding default init ~ N(0, 1); axial weights are learned params —
    #  use random values here so the correctness check is discriminating.)
    word_table = jax.random.normal(k_emb, (vocab_size, hidden_size), jnp.float32)
    w0 = jax.random.normal(k_w0, (axial_pos_shape[0], axial_pos_embds_dim[0]),
                           jnp.float32)
    w1 = jax.random.normal(k_w1, (axial_pos_shape[1], axial_pos_embds_dim[1]),
                           jnp.float32)

    # ---- inputs ----
    input_ids = jax.random.randint(k_ids, (B, S), 0, vocab_size, jnp.int32)
    # default position_ids = arange(start, start + seq_len) broadcast over batch
    start_idx_pos_encodings = 0
    position_ids = jnp.broadcast_to(
        jnp.arange(start_idx_pos_encodings, start_idx_pos_encodings + S,
                   dtype=jnp.int32)[None, :], (B, S))
    # Precondition of the eval path: all position ids < prod(axial_pos_shape).
    assert int(position_ids.max()) < axial_pos_shape[0] * axial_pos_shape[1]

    # Build the positional LUT once (init-time), then apply the jitted kernel.
    pos_lut = build_pos_lut(w0, w1)
    out = lol_embeddings_apply(input_ids, position_ids, word_table, pos_lut)
    out = jax.block_until_ready(out)

    # ---- pure-JAX reference (same semantics as the PyTorch forward, p=0) ----
    ax1 = axial_pos_shape[1]
    ref_word = word_table[input_ids]                              # (B, S, H)
    ref_pos = jnp.concatenate(
        [w0[position_ids // ax1], w1[position_ids % ax1]], axis=-1)
    ref = ref_word + ref_pos

    assert out.shape == (B, S, hidden_size)
    assert jnp.allclose(out, ref, atol=1e-5, rtol=1e-5)
    print("KERNEL_OK")
</pallas_src>

<mosaic_0001>
module attributes {stable_mosaic.version = 11 : i64} {
  func.func @_lol_embeddings_kernel(%arg0: memref<128x2xi32, #tpu.memory_space<vmem>>, %arg1: memref<128x128xf32, #tpu.memory_space<vmem>>, %arg2: memref<64x128xf32, #tpu.memory_space<vmem>>, %arg3: memref<128x128xf32, #tpu.memory_space<vmem>>) attributes {dimension_semantics = [], scalar_prefetch = 0 : i64, scratch_operands = 0 : i64, tpu.core_type = #tpu.core_type<tc>} {
    %c0 = arith.constant 0 : index
    %c0_0 = arith.constant 0 : index
    %0 = vector.load %arg0[%c0, %c0_0] : memref<128x2xi32, #tpu.memory_space<vmem>>, vector<128x2xi32>
    %1 = vector.extract_strided_slice %0 {offsets = [0, 0], sizes = [128, 1], strides = [1, 1]} : vector<128x2xi32> to vector<128x1xi32>
    %2 = vector.extract_strided_slice %0 {offsets = [0, 1], sizes = [128, 1], strides = [1, 1]} : vector<128x2xi32> to vector<128x1xi32>
    %3 = tpu.iota {dimensions = array<i32: 1>} : vector<128x128xi32>
    %4 = vector.broadcast %1 : vector<128x1xi32> to vector<128x128xi32>
    %5 = arith.cmpi eq, %3, %4 : vector<128x128xi32>
    %6 = arith.extui %5 : vector<128x128xi1> to vector<128x128xi32>
    %7 = arith.sitofp %6 : vector<128x128xi32> to vector<128x128xf32>
    %c0_1 = arith.constant 0 : index
    %c0_2 = arith.constant 0 : index
    %8 = vector.load %arg1[%c0_1, %c0_2] : memref<128x128xf32, #tpu.memory_space<vmem>>, vector<128x128xf32>
    %cst = arith.constant dense<0.000000e+00> : vector<128x128xf32>
    %9 = tpu.matmul %7, %8, %cst {dimension_numbers = #tpu.dot_dimension_numbers<[1], [0], [0], [1], [0, 0, 1, 1], [], []>} : vector<128x128xf32>, vector<128x128xf32>, vector<128x128xf32> -> vector<128x128xf32>
    %10 = tpu.iota {dimensions = array<i32: 1>} : vector<128x64xi32>
    %11 = vector.broadcast %2 : vector<128x1xi32> to vector<128x64xi32>
    %12 = arith.cmpi eq, %10, %11 : vector<128x64xi32>
    %13 = arith.extui %12 : vector<128x64xi1> to vector<128x64xi32>
    %14 = arith.sitofp %13 : vector<128x64xi32> to vector<128x64xf32>
    %c0_3 = arith.constant 0 : index
    %c0_4 = arith.constant 0 : index
    %15 = vector.load %arg2[%c0_3, %c0_4] : memref<64x128xf32, #tpu.memory_space<vmem>>, vector<64x128xf32>
    %cst_5 = arith.constant dense<0.000000e+00> : vector<128x128xf32>
    %16 = tpu.matmul %14, %15, %cst_5 {dimension_numbers = #tpu.dot_dimension_numbers<[1], [0], [0], [1], [0, 0, 1, 1], [], []>} : vector<128x64xf32>, vector<64x128xf32>, vector<128x128xf32> -> vector<128x128xf32>
    %17 = arith.addf %9, %16 : vector<128x128xf32>
    %c0_6 = arith.constant 0 : index
    %c0_7 = arith.constant 0 : index
    %18 = vector.load %arg3[%c0_6, %c0_7] : memref<128x128xf32, #tpu.memory_space<vmem>>, vector<128x128xf32>
    tpu.vector_store %arg3[%c0_6, %c0_7], %17 {strides = array<i32>} : memref<128x128xf32, #tpu.memory_space<vmem>>, vector<128x128xf32>,
    return
  }
}

</mosaic_0001>

<bundles_post_ra>
// kernel: lol_embeddings_apply.1
= control target key start
LH: loop header
LB: loop body
LE: loop exit
PB: predicated region body
PF: predicated region fallthrough
CT: control target
= control target key end

     0   :  { %8 = vsyncpa [#allocation3], 0  ;;  %s1317_s0 = inlined_call_operand.vmem [shape: s32[128,2], index: 0, kind: input, shape index: {}]   ;;  %s1318_s1 = inlined_call_operand.vmem [shape: f32[128,128], index: 1, kind: input, shape index: {}]   ;;  %s1319_s2 = inlined_call_operand.hbm [shape: f32[64,128], index: 2, kind: input, shape index: {}]   ;;  %s1320_s3 = inlined_call_operand.hbm [shape: f32[128,128], index: 3, kind: output, shape index: {}]  }
   0x1   :  { %9 = vsyncpa [#allocation4], 0  ;;  %s1002_s12 = smov [#allocation2]   ;;  %s954_s16 = scalar_lea.hbm %s1319_s2, 1024 }
   0x2   :  { %s19_s13 = sshll.u32 %s1002_s12, 4  ;;  %p955_p0 = scmp.ne.s32.totalorder %s1319_s2, %s954_s16  ;;  %s20_s13 = int_to_ptr.vmem [resolvable:$true] %s19_s13 }
   0x3   :  { %p958_p1 = scmp.lt.u32.totalorder %s954_s16, %s1319_s2 }
   0x5   :  { %p960_p2 = pnand %p958_p1, %p955_p0 }
   0x7   :  { %963 = shalt.err (!%p960_p2)
}
   0x8   :  { %s964_s21 = scalar_lea.vmem %s20_s13, 1024  ;;  %p969_p4 = scmp.lt.s32.totalorder %s20_s13, %s20_s13 }
   0x9   :  { %p965_p3 = scmp.ne.s32.totalorder %s20_s13, %s964_s21  ;;  %p970_p5 = scmp.lt.s32.totalorder %s964_s21, %s964_s21 }
   0xb   :  { %p971_p6 = por %p970_p5, %p969_p4 }
   0xd   :  { %p972_p7 = pnand %p971_p6, %p965_p3 }
   0xf   :  { %975 = shalt.err (!%p972_p7)
}
  0x10   :  { %s1003_s22 = smov 128   ;;  %s1004_s23 = smov 8  }
  0x11   :  { %25 = dma.hbm_to_vmem [thread:$0]  %s1319_s2, 1024, %s20_s13, [#allocation3], %s1003_s22, %s1003_s22, %s1004_s23  }
  0x12   :  { %998 = dma.done.wait [#allocation3], 1024  }
  0x13   :  { %999 = vsyncadd [#allocation3], 4294966272  ;;  %v1005_v0 = vmov 1   ;;  %v1050_v1 = vld [vmem:[%s1317_s0 + $0x10] sm:$0xff]  ;;  %v1055_v2 = vld [vmem:[%s1317_s0] sm:$0xff]  ;;  %v1006_v5 = vmov 0   ;;  %v45_v54 = vlaneseq }
  0x14   :  { %940 = vset.pattern.permute.xlu1 %v1005_v0  ;;  %939 = vset.pattern.permute.xlu0 %v1005_v0  ;;  %v1062_v3 = vld [vmem:[%s1317_s0 + $0x18] sm:$0xff]  ;;  %v33_v4 = vld [vmem:[%s1317_s0 + $0x20] sm:$0xff]  ;;  %v34_v6 = vld [vmem:[%s1317_s0 + $0x28] sm:$0xff]  ;;  %vm263_vm0 = vcmask 523264   ;;  %v1007_v58 = vmov 0.0   ;;  %v1008_v62 = vmov 1.0  }
  0x15   :  { %166 = vperm.xlu1 %940, %v1050_v1   ;;  %160 = vperm.xlu0 %939, %v1055_v2   ;;  %v143_v7 = vld [vmem:[%s1318_s1] sm:$0xff]  ;;  %v144_v8 = vld [vmem:[%s1318_s1 + $0x8] sm:$0xff]  ;;  %v145_v10 = vld [vmem:[%s1318_s1 + $0x10] sm:$0xff]  ;;  %v1205_v55 = vand.u32 127, %v45_v54 }
  0x16   :  { %v1078_v9 = vpack.c.bf16 %v144_v8, %v143_v7  ;;  %v146_v11 = vld [vmem:[%s1318_s1 + $0x18] sm:$0xff]  ;;  %v147_v12 = vld [vmem:[%s1318_s1 + $0x20] sm:$0xff]  ;;  %v148_v14 = vld [vmem:[%s1318_s1 + $0x28] sm:$0xff] }
  0x17   :  { %v1089_v13 = vpack.c.bf16 %v146_v11, %v145_v10  ;;  %v255_v15 = vld [vmem:[#allocation2] sm:$0xff]  ;;  %v256_v16 = vld [vmem:[#allocation2 + $0x8] sm:$0xff]  ;;  %v257_v19 = vld [vmem:[#allocation2 + $0x10] sm:$0xff]  ;;  %v1106_v22 = vpack.c.bf16 %v148_v14, %v147_v12 }
  0x18   :  { %v1097_v17 = vld [vmem:[%s1317_s0 + $0x8] sm:$0xff]  ;;  %899 = vmatprep.subr.bf16.mxu1 %v1078_v9  ;;  %v851_v18 = vpack.c.bf16 %v256_v16, %v255_v15  ;;  %v258_v20 = vld [vmem:[#allocation2 + $0x18] sm:$0xff]  ;;  %v149_v24 = vld [vmem:[%s1318_s1 + $0x30] sm:$0xff] }
  0x19   :  { %169 = vperm.xlu1 %940, %v1062_v3   ;;  %941 = vset.pattern.permute.xlu0 %v1006_v5  ;;  %v36_v21 = vld [vmem:[%s1317_s0 + $0x38] sm:$0xff]  ;;  %v855_v23 = vpack.c.bf16 %v258_v20, %v257_v19  ;;  %v259_v26 = vld [vmem:[#allocation2 + $0x20] sm:$0xff]  ;;  %v260_v27 = vld [vmem:[#allocation2 + $0x28] sm:$0xff] }
  0x1a   :  { %60 = vperm.xlu0 %941, %v33_v4   ;;  %907 = vmatpush3.bf16.msra.mxu1 %v1078_v9  ;;  %v150_v25 = vld [vmem:[%s1318_s1 + $0x38] sm:$0xff]  ;;  %v261_v29 = vld [vmem:[#allocation2 + $0x30] sm:$0xff]  ;;  %v151_v31 = vld [vmem:[%s1318_s1 + $0x40] sm:$0xff]  ;;  %v859_v33 = vpack.c.bf16 %v260_v27, %v259_v26 }
  0x1b   :  { %900 = vmatprep.subr.bf16.mxu1 %v1089_v13  ;;  %852 = vmatprep.subr.bf16.mxu0 %v851_v18  ;;  %v1117_v28 = vpack.c.bf16 %v150_v25, %v149_v24  ;;  %v262_v30 = vld [vmem:[#allocation2 + $0x38] sm:$0xff]  ;;  %v152_v32 = vld [vmem:[%s1318_s1 + $0x48] sm:$0xff]  ;;  %v35_v34 = vld [vmem:[%s1317_s0 + $0x30] sm:$0xff] }
  0x1c   :  { %854 = vmatpush3.bf16.msra.mxu0 %v851_v18  ;;  %v863_v35 = vpack.c.bf16 %v262_v30, %v261_v29  ;;  %v1131_v36 = vpack.c.bf16 %v152_v32, %v151_v31  ;;  %v153_v37 = vld [vmem:[%s1318_s1 + $0x50] sm:$0xff]  ;;  %v154_v38 = vld [vmem:[%s1318_s1 + $0x58] sm:$0xff]  ;;  %v37_v39 = vld [vmem:[%s1317_s0 + $0x40] sm:$0xff] }
  0x1d   :  { %175 = vperm.xlu1 %940, %v34_v6   ;;  %856 = vmatprep.subr.bf16.mxu0 %v855_v23  ;;  %v38_v40 = vld [vmem:[%s1317_s0 + $0x48] sm:$0xff]  ;;  %v1148_v41 = vpack.c.bf16 %v154_v38, %v153_v37  ;;  %v155_v42 = vld [vmem:[%s1318_s1 + $0x60] sm:$0xff]  ;;  %v39_v44 = vld [vmem:[%s1317_s0 + $0x50] sm:$0xff] }
  0x1e   :  { %942 = vset.pattern.permute.xlu0 %v1005_v0  ;;  %908 = vmatpush3.bf16.msra.mxu1 %v1089_v13  ;;  %v156_v43 = vld [vmem:[%s1318_s1 + $0x68] sm:$0xff]  ;;  %v157_v46 = vld [vmem:[%s1318_s1 + $0x70] sm:$0xff]  ;;  %v158_v47 = vld [vmem:[%s1318_s1 + $0x78] sm:$0xff] }
  0x1f   :  { %163 = vperm.xlu0 %942, %v1097_v17   ;;  %901 = vmatprep.subr.bf16.mxu1 %v1106_v22  ;;  %v1162_v45 = vpack.c.bf16 %v156_v43, %v155_v42  ;;  %v42_v48 = vld [vmem:[%s1317_s0 + $0x68] sm:$0xff]  ;;  %v1176_v49 = vpack.c.bf16 %v158_v47, %v157_v46  ;;  %v43_v50 = vld [vmem:[%s1317_s0 + $0x70] sm:$0xff]  ;;  %v40_v51 = vld [vmem:[%s1317_s0 + $0x58] sm:$0xff] }
  0x20   :  { %858 = vmatpush3.bf16.msra.mxu0 %v855_v23  ;;  %v41_v52 = vld [vmem:[%s1317_s0 + $0x60] sm:$0xff]  ;;  %v44_v53 = vld [vmem:[%s1317_s0 + $0x78] sm:$0xff]  ;;  %s1009_s0 = smov [#allocation5]  }
  0x21   :  { %181 = vperm.xlu1 %940, %v36_v21   ;;  %860 = vmatprep.subr.bf16.mxu0 %v859_v33  ;;  %s623_s9 = sshll.u32 %s1009_s0, 4  ;;  %s624_s9 = int_to_ptr.vmem [resolvable:$true] %s623_s9 }
  0x22   :  { %909 = vmatpush3.bf16.msra.mxu1 %v1106_v22  ;;  %s976_s10 = scalar_lea.vmem %s624_s9, 2048  ;;  %p981_p9 = scmp.lt.s32.totalorder %s624_s9, %s624_s9 }
  0x23   :  { %172 = vperm.xlu0 %942, %v33_v4   ;;  %902 = vmatprep.subr.bf16.mxu1 %v1117_v28  ;;  %p977_p8 = scmp.ne.s32.totalorder %s624_s9, %s976_s10  ;;  %p982_p10 = scmp.lt.s32.totalorder %s976_s10, %s976_s10 }
  0x24   :  { %862 = vmatpush3.bf16.msra.mxu0 %v859_v33 }
  0x25   :  { %943 = vset.pattern.permute.xlu1 %v1006_v5  ;;  %864 = vmatprep.subr.bf16.mxu0 %v863_v35  ;;  %p983_p11 = por %p982_p10, %p981_p9 }
  0x26   :  { %63 = vperm.xlu1 %943, %v34_v6   ;;  %910 = vmatpush3.bf16.msra.mxu1 %v1117_v28 }
  0x27   :  { %178 = vperm.xlu0 %942, %v35_v34   ;;  %903 = vmatprep.subr.bf16.mxu1 %v1131_v36  ;;  %p984_p12 = pnand %p983_p11, %p977_p8 }
  0x28   :  { %866 = vmatpush3.bf16.msra.mxu0 %v863_v35 }
  0x29   :  { %868 = vmatprep.subr.bf16.mxu0 %v1078_v9 }
  0x2a   :  { %944 = vset.pattern.permute.xlu1 %v1005_v0  ;;  %911 = vmatpush3.bf16.msra.mxu1 %v1131_v36 }
  0x2b   :  { %184 = vperm.xlu1 %944, %v37_v39   ;;  %187 = vperm.xlu0 %942, %v38_v40  }
  0x2c   :  { %904 = vmatprep.subr.bf16.mxu1 %v1148_v41 }
  0x2e   :  { %912 = vmatpush3.bf16.msra.mxu1 %v1148_v41 }
  0x2f   :  { %945 = vset.pattern.permute.xlu1 %v1006_v5  ;;  %190 = vperm.xlu0 %942, %v39_v44  }
  0x30   :  { %66 = vperm.xlu1 %945, %v35_v34   ;;  %905 = vmatprep.subr.bf16.mxu1 %v1162_v45 }
  0x32   :  { %913 = vmatpush3.bf16.msra.mxu1 %v1162_v45 }
  0x33   :  { %199 = vperm.xlu0 %942, %v42_v48   ;;  %906 = vmatprep.subr.bf16.mxu1 %v1176_v49 }
  0x34   :  { %69 = vperm.xlu1 %945, %v36_v21  }
  0x36   :  { %914 = vmatpush3.bf16.msra.mxu1 %v1176_v49 }
  0x37   :  { %202 = vperm.xlu0 %942, %v43_v50  }
  0x38   :  { %946 = vset.pattern.permute.xlu1 %v1005_v0 }
  0x39   :  { %193 = vperm.xlu1 %946, %v40_v51  }
  0x3b   :  { %950 = vset.pattern.permute.xlu0 %v1006_v5 }
  0x3c   :  { %72 = vperm.xlu0 %950, %v37_v39  }
  0x3d   :  { %947 = vset.pattern.permute.xlu1 %v1006_v5 }
  0x3e   :  { %75 = vperm.xlu1 %947, %v38_v40  }
  0x40   :  { %84 = vperm.xlu0 %950, %v41_v52  }
  0x42   :  { %948 = vset.pattern.permute.xlu1 %v1005_v0 }
  0x43   :  { %196 = vperm.xlu1 %948, %v41_v52  }
  0x44   :  { %51 = vperm.xlu0 %950, %v1097_v17  }
  0x47   :  { %949 = vset.pattern.permute.xlu1 %v1006_v5 }
  0x48   :  { %78 = vperm.xlu1 %949, %v39_v44   ;;  %93 = vperm.xlu0 %950, %v44_v53  }
  0x4c   :  { %81 = vperm.xlu1 %949, %v40_v51   ;;  %57 = vperm.xlu0 %950, %v1062_v3  }
  0x50   :  { %951 = vset.pattern.permute.xlu1 %v1005_v0  ;;  %953 = vset.pattern.permute.xlu0 %v1005_v0 }
  0x51   :  { %205 = vperm.xlu1 %951, %v44_v53  }
  0x55   :  { %952 = vset.pattern.permute.xlu1 %v1006_v5 }
  0x56   :  { %87 = vperm.xlu1 %952, %v42_v48  }
  0x5a   :  { %48 = vperm.xlu1 %952, %v1055_v2  }
  0x5e   :  { %90 = vperm.xlu1 %952, %v43_v50  }
  0x62   :  { %54 = vperm.xlu1 %952, %v1050_v1  }
  0x94   :  { %v167_v56 = vpop.permute.xlu1 %166  ;;  %v161_v57 = vpop.permute.xlu0 %160 }
  0x95   :  { %vm207_vm1 = vcmp.eq.s32.totalorder %v1205_v55, %v161_v57  ;;  %vm209_vm3 = vcmp.eq.s32.totalorder %v1205_v55, %v167_v56 }
  0x96   :  { %v651_v59 = vsel %vm207_vm1, 1.0, %v1007_v58  ;;  %v653_v3 = vsel %vm209_vm3, 1.0, %v1007_v58 }
  0x97   :  { %771 = vmatprep.mubr.msk.f32.mxu0 %vm263_vm0, %v651_v59 }
  0x98   :  { %v170_v60 = vpop.permute.xlu1 %169 }
  0x99   :  { %v61_v61 = vpop.permute.xlu0 %60  ;;  %vm210_vm5 = vcmp.eq.s32.totalorder %v1205_v55, %v170_v60 }
  0x9a   :  { %vm99_vm2 = vcmp.eq.s32.totalorder %v1205_v55, %v61_v61  ;;  %v654_v5 = vsel %vm210_vm5, 1.0, %v1007_v58 }
  0x9b   :  { %833 = vmatprep.mubr.msk.f32.mxu1 %vm99_vm2, %v1008_v62 }
  0x9c   :  { %v176_v63 = vpop.permute.xlu1 %175 }
  0x9d   :  { %vm212_vm7 = vcmp.eq.s32.totalorder %v1205_v55, %v176_v63 }
  0x9e   :  { %v164_v0 = vpop.permute.xlu0 %163 }
  0x9f   :  { %vm208_vm4 = vcmp.eq.s32.totalorder %v1205_v55, %v164_v0 }
  0xa0   :  { %v652_v1 = vsel %vm208_vm4, 1.0, %v1007_v58  ;;  %v182_v2 = vpop.permute.xlu1 %181 }
  0xa1   :  { %772 = vmatmul.mubr.msk.f32.vlgmr.msra.gmra.mrb[0].mxu0 %vm263_vm0, %v652_v1  ;;  %vm214_vm10 = vcmp.eq.s32.totalorder %v1205_v55, %v182_v2 }
  0xa2   :  { %774 = vmatprep.mubr.msk.f32.mxu0 %vm263_vm0, %v653_v3  ;;  %v173_v4 = vpop.permute.xlu0 %172  ;;  %870 = vmatpush3.bf16.msra.mxu0 %v1078_v9  ;;  %v656_v9 = vsel %vm212_vm7, 1.0, %v1007_v58 }
  0xa3   :  { %vm211_vm6 = vcmp.eq.s32.totalorder %v1205_v55, %v173_v4  ;;  %872 = vmatprep.subr.bf16.mxu0 %v1089_v13 }
  0xa4   :  { %v655_v6 = vsel %vm211_vm6, 1.0, %v1007_v58 }
  0xa5   :  { %v64_v7 = vpop.permute.xlu1 %63  ;;  %775 = vmatmul.mubr.msk.f32.gmra.mrb[2].mxu0 %vm263_vm0, %v654_v5 }
  0xa6   :  { %vm100_vm8 = vcmp.eq.s32.totalorder %v1205_v55, %v64_v7  ;;  %v179_v8 = vpop.permute.xlu0 %178  ;;  %777 = vmatprep.mubr.msk.f32.mxu0 %vm263_vm0, %v655_v6  ;;  %874 = vmatpush3.bf16.msra.mxu0 %v1089_v13  ;;  %v658_v13 = vsel %vm214_vm10, 1.0, %v1007_v58 }
  0xa7   :  { %vm213_vm9 = vcmp.eq.s32.totalorder %v1205_v55, %v179_v8  ;;  %834 = vmatmul.mubr.msk.f32.vlgmr.msra.gmra.mrb[0].mxu1 %vm100_vm8, %v1008_v62  ;;  %876 = vmatprep.subr.bf16.mxu0 %v1106_v22 }
  0xa8   :  { %v657_v10 = vsel %vm213_vm9, 1.0, %v1007_v58 }
  0xa9   :  { %778 = vmatmul.mubr.msk.f32.gmra.mrb[4].mxu0 %vm263_vm0, %v656_v9 }
  0xaa   :  { %v185_v11 = vpop.permute.xlu1 %184  ;;  %v188_v12 = vpop.permute.xlu0 %187  ;;  %780 = vmatprep.mubr.msk.f32.mxu0 %vm263_vm0, %v657_v10  ;;  %878 = vmatpush3.bf16.msra.mxu0 %v1106_v22 }
  0xab   :  { %vm215_vm11 = vcmp.eq.s32.totalorder %v1205_v55, %v185_v11  ;;  %vm216_vm12 = vcmp.eq.s32.totalorder %v1205_v55, %v188_v12  ;;  %880 = vmatprep.subr.bf16.mxu0 %v1117_v28 }
  0xac   :  { %v659_v14 = vsel %vm215_vm11, 1.0, %v1007_v58  ;;  %v660_v15 = vsel %vm216_vm12, 1.0, %v1007_v58 }
  0xad   :  { %781 = vmatmul.mubr.msk.f32.gmra.mrb[6].mxu0 %vm263_vm0, %v658_v13 }
  0xae   :  { %783 = vmatprep.mubr.msk.f32.mxu0 %vm263_vm0, %v659_v14  ;;  %v191_v16 = vpop.permute.xlu0 %190  ;;  %882 = vmatpush3.bf16.msra.mxu0 %v1117_v28 }
  0xaf   :  { %vm217_vm13 = vcmp.eq.s32.totalorder %v1205_v55, %v191_v16  ;;  %v67_v17 = vpop.permute.xlu1 %66  ;;  %884 = vmatprep.subr.bf16.mxu0 %v1131_v36 }
  0xb0   :  { %v661_v18 = vsel %vm217_vm13, 1.0, %v1007_v58  ;;  %vm101_vm14 = vcmp.eq.s32.totalorder %v1205_v55, %v67_v17 }
  0xb1   :  { %836 = vmatprep.mubr.msk.f32.mxu1 %vm101_vm14, %v1008_v62  ;;  %784 = vmatmul.mubr.msk.f32.gmra.mrb[8].mxu0 %vm263_vm0, %v660_v15 }
  0xb2   :  { %v200_v19 = vpop.permute.xlu0 %199  ;;  %786 = vmatprep.mubr.msk.f32.mxu0 %vm263_vm0, %v661_v18  ;;  %886 = vmatpush3.bf16.msra.mxu0 %v1131_v36 }
  0xb3   :  { %v70_v20 = vpop.permute.xlu1 %69  ;;  %888 = vmatprep.subr.bf16.mxu0 %v1148_v41  ;;  %vm220_vm4 = vcmp.eq.s32.totalorder %v1205_v55, %v200_v19 }
  0xb4   :  { %vm102_vm15 = vcmp.eq.s32.totalorder %v1205_v55, %v70_v20  ;;  %v664_v28 = vsel %vm220_vm4, 1.0, %v1007_v58 }
  0xb5   :  { %837 = vmatmul.mubr.msk.f32.gmra.mrb[2].mxu1 %vm102_vm15, %v1008_v62 }
  0xb6   :  { %890 = vmatpush3.bf16.msra.mxu0 %v1148_v41  ;;  %v203_v21 = vpop.permute.xlu0 %202 }
  0xb7   :  { %892 = vmatprep.subr.bf16.mxu0 %v1162_v45  ;;  %vm221_vm5 = vcmp.eq.s32.totalorder %v1205_v55, %v203_v21 }
  0xb8   :  { %v194_v22 = vpop.permute.xlu1 %193  ;;  %v665_v29 = vsel %vm221_vm5, 1.0, %v1007_v58 }
  0xb9   :  { %vm218_vm1 = vcmp.eq.s32.totalorder %v1205_v55, %v194_v22 }
  0xba   :  { %v662_v23 = vsel %vm218_vm1, 1.0, %v1007_v58  ;;  %894 = vmatpush3.bf16.msra.mxu0 %v1162_v45 }
  0xbb   :  { %787 = vmatmul.mubr.msk.f32.gmra.mrb[10].mxu0 %vm263_vm0, %v662_v23  ;;  %v73_v24 = vpop.permute.xlu0 %72  ;;  %896 = vmatprep.subr.bf16.mxu0 %v1176_v49 }
  0xbc   :  { %vm103_vm2 = vcmp.eq.s32.totalorder %v1205_v55, %v73_v24 }
  0xbd   :  { %v76_v25 = vpop.permute.xlu1 %75  ;;  %839 = vmatprep.mubr.msk.f32.mxu1 %vm103_vm2, %v1008_v62 }
  0xbe   :  { %vm104_vm3 = vcmp.eq.s32.totalorder %v1205_v55, %v76_v25  ;;  %898 = vmatpush3.bf16.msra.mxu0 %v1176_v49 }
  0xbf   :  { %840 = vmatmul.mubr.msk.f32.gmra.mrb[4].mxu1 %vm104_vm3, %v1008_v62  ;;  %v85_v31 = vpop.permute.xlu0 %84 }
  0xc0   :  { %vm107_vm8 = vcmp.eq.s32.totalorder %v1205_v55, %v85_v31 }
  0xc2   :  { %v197_v26 = vpop.permute.xlu1 %196 }
  0xc3   :  { %vm219_vm6 = vcmp.eq.s32.totalorder %v1205_v55, %v197_v26  ;;  %v52_v35 = vpop.permute.xlu0 %51 }
  0xc4   :  { %v663_v27 = vsel %vm219_vm6, 1.0, %v1007_v58  ;;  %vm96_vm13 = vcmp.eq.s32.totalorder %v1205_v55, %v52_v35 }
  0xc5   :  { %789 = vmatprep.mubr.msk.f32.mxu0 %vm263_vm0, %v663_v27 }
  0xc6   :  { %790 = vmatmul.mubr.msk.f32.gmra.mrb[12].mxu0 %vm263_vm0, %v664_v28 }
  0xc7   :  { %v79_v30 = vpop.permute.xlu1 %78  ;;  %792 = vmatprep.mubr.msk.f32.mxu0 %vm263_vm0, %v665_v29  ;;  %v94_v38 = vpop.permute.xlu0 %93 }
  0xc8   :  { %vm105_vm7 = vcmp.eq.s32.totalorder %v1205_v55, %v79_v30 }
  0xc9   :  { %842 = vmatprep.mubr.msk.f32.mxu1 %vm105_vm7, %v1008_v62 }
  0xcb   :  { %v82_v32 = vpop.permute.xlu1 %81  ;;  %v58_v40 = vpop.permute.xlu0 %57 }
  0xcc   :  { %vm106_vm9 = vcmp.eq.s32.totalorder %v1205_v55, %v82_v32  ;;  %vm98_vm1 = vcmp.eq.s32.totalorder %v1205_v55, %v58_v40 }
  0xcd   :  { %843 = vmatmul.mubr.msk.f32.gmra.mrb[6].mxu1 %vm106_vm9, %v1008_v62 }
  0xce   :  { %845 = vmatprep.mubr.msk.f32.mxu1 %vm107_vm8, %v1008_v62 }
  0xd0   :  { %v206_v33 = vpop.permute.xlu1 %205 }
  0xd1   :  { %vm222_vm10 = vcmp.eq.s32.totalorder %v1205_v55, %v206_v33 }
  0xd2   :  { %v666_v34 = vsel %vm222_vm10, 1.0, %v1007_v58 }
  0xd3   :  { %793 = vmatmul.mubr.msk.f32.gmra.mrb[14].mxu0 %vm263_vm0, %v666_v34  ;;  %vm110_vm0 = vcmp.eq.s32.totalorder %v1205_v55, %v94_v38 }
  0xd5   :  { %v88_v36 = vpop.permute.xlu1 %87 }
  0xd6   :  { %vm108_vm11 = vcmp.eq.s32.totalorder %v1205_v55, %v88_v36 }
  0xd7   :  { %846 = vmatmul.mubr.msk.f32.gmra.mrb[8].mxu1 %vm108_vm11, %v1008_v62 }
  0xd9   :  { %v49_v37 = vpop.permute.xlu1 %48 }
  0xda   :  { %vm95_vm12 = vcmp.eq.s32.totalorder %v1205_v55, %v49_v37 }
  0xdb   :  { %827 = vmatprep.mubr.msk.f32.mxu0 %vm95_vm12, %v1008_v62 }
  0xdc   :  { %828 = vmatmul.mubr.msk.f32.vlgmr.msra.gmra.mrb[0].mxu0 %vm96_vm13, %v1008_v62 }
  0xdd   :  { %v91_v39 = vpop.permute.xlu1 %90 }
  0xde   :  { %vm109_vm14 = vcmp.eq.s32.totalorder %v1205_v55, %v91_v39 }
  0xdf   :  { %848 = vmatprep.mubr.msk.f32.mxu1 %vm109_vm14, %v1008_v62 }
  0xe0   :  { %849 = vmatmul.mubr.msk.f32.gmra.mrb[10].mxu1 %vm110_vm0, %v1008_v62 }
  0xe1   :  { %v55_v41 = vpop.permute.xlu1 %54 }
  0xe2   :  { %vm97_vm15 = vcmp.eq.s32.totalorder %v1205_v55, %v55_v41 }
  0xe3   :  { %830 = vmatprep.mubr.msk.f32.mxu0 %vm97_vm15, %v1008_v62 }
  0xe4   :  { %831 = vmatmul.mubr.msk.f32.gmra.mrb[2].mxu0 %vm98_vm1, %v1008_v62 }
 0x17a   :  { %v835_v42 = vpop.f32.mrb[0].mxu1 }
 0x17b   :  { %v543_v43 = vpop.f32.mrb[1].mxu1 }
 0x17c   :  { %v779_v44 = vpop.f32.mrb[4].mxu0 }
 0x17d   :  { %v549_v45 = vadd.f32 %v835_v42, %v779_v44  ;;  %v398_v46 = vpop.f32.mrb[5].mxu0 }
 0x17e   :  { %v544_v47 = vadd.f32 %v543_v43, %v398_v46 }
 0x17f   :  { %607 = vst [vmem:[#allocation5 + $0x28] sm:$0xff] %v549_v45 }
 0x180   :  { %606 = vst [vmem:[#allocation5 + $0x20] sm:$0xff] %v544_v47  ;;  %v782_v48 = vpop.f32.mrb[6].mxu0 }
 0x181   :  { %v408_v49 = vpop.f32.mrb[7].mxu0 }
 0x184   :  { %v785_v50 = vpop.f32.mrb[8].mxu0 }
 0x185   :  { %v418_v51 = vpop.f32.mrb[9].mxu0 }
 0x188   :  { %v838_v52 = vpop.f32.mrb[2].mxu1 }
 0x189   :  { %v559_v53 = vadd.f32 %v838_v52, %v782_v48  ;;  %v553_v54 = vpop.f32.mrb[3].mxu1 }
 0x18a   :  { %v554_v55 = vadd.f32 %v553_v54, %v408_v49 }
 0x18b   :  { %609 = vst [vmem:[#allocation5 + $0x38] sm:$0xff] %v559_v53 }
 0x18c   :  { %608 = vst [vmem:[#allocation5 + $0x30] sm:$0xff] %v554_v55 }
 0x18e   :  { %v788_v56 = vpop.f32.mrb[10].mxu0 }
 0x18f   :  { %v428_v57 = vpop.f32.mrb[11].mxu0 }
 0x192   :  { %v841_v58 = vpop.f32.mrb[4].mxu1 }
 0x193   :  { %v569_v59 = vadd.f32 %v841_v58, %v785_v50  ;;  %v563_v60 = vpop.f32.mrb[5].mxu1 }
 0x194   :  { %v564_v61 = vadd.f32 %v563_v60, %v418_v51 }
 0x195   :  { %611 = vst [vmem:[#allocation5 + $0x48] sm:$0xff] %v569_v59 }
 0x196   :  { %610 = vst [vmem:[#allocation5 + $0x40] sm:$0xff] %v564_v61 }
 0x199   :  { %v791_v62 = vpop.f32.mrb[12].mxu0 }
 0x19a   :  { %v438_v63 = vpop.f32.mrb[13].mxu0 }
 0x1a0   :  { %v844_v0 = vpop.f32.mrb[6].mxu1 }
 0x1a1   :  { %v579_v1 = vadd.f32 %v844_v0, %v788_v56  ;;  %v573_v2 = vpop.f32.mrb[7].mxu1 }
 0x1a2   :  { %v574_v3 = vadd.f32 %v573_v2, %v428_v57 }
 0x1a3   :  { %613 = vst [vmem:[#allocation5 + $0x58] sm:$0xff] %v579_v1 }
 0x1a4   :  { %612 = vst [vmem:[#allocation5 + $0x50] sm:$0xff] %v574_v3 }
 0x1a6   :  { %v794_v4 = vpop.f32.mrb[14].mxu0 }
 0x1a7   :  { %v448_v5 = vpop.f32.mrb[15].mxu0 }
 0x1aa   :  { %v847_v6 = vpop.f32.mrb[8].mxu1 }
 0x1ab   :  { %v589_v7 = vadd.f32 %v847_v6, %v791_v62  ;;  %v583_v8 = vpop.f32.mrb[9].mxu1 }
 0x1ac   :  { %v584_v9 = vadd.f32 %v583_v8, %v438_v63 }
 0x1ad   :  { %615 = vst [vmem:[#allocation5 + $0x68] sm:$0xff] %v589_v7 }
 0x1ae   :  { %614 = vst [vmem:[#allocation5 + $0x60] sm:$0xff] %v584_v9 }
 0x1af   :  { %v829_v10 = vpop.f32.mrb[0].mxu0 }
 0x1b0   :  { %603 = vst [vmem:[#allocation5 + $0x8] sm:$0xff] %v829_v10  ;;  %v523_v11 = vpop.f32.mrb[1].mxu0 }
 0x1b1   :  { %602 = vst [vmem:[#allocation5] sm:$0xff] %v523_v11 }
 0x1b3   :  { %v850_v12 = vpop.f32.mrb[10].mxu1 }
 0x1b4   :  { %v599_v13 = vadd.f32 %v850_v12, %v794_v4  ;;  %v593_v14 = vpop.f32.mrb[11].mxu1 }
 0x1b5   :  { %v594_v15 = vadd.f32 %v593_v14, %v448_v5 }
 0x1b6   :  { %617 = vst [vmem:[#allocation5 + $0x78] sm:$0xff] %v599_v13 }
 0x1b7   :  { %616 = vst [vmem:[#allocation5 + $0x70] sm:$0xff] %v594_v15  ;;  %v832_v16 = vpop.f32.mrb[2].mxu0 }
 0x1b8   :  { %605 = vst [vmem:[#allocation5 + $0x18] sm:$0xff] %v832_v16  ;;  %v533_v17 = vpop.f32.mrb[3].mxu0 }
 0x1b9   :  { %604 = vst [vmem:[#allocation5 + $0x10] sm:$0xff] %v533_v17 }
 0x1ba   :  { %987 = shalt.err (!%p984_p12)
}
 0x1bb   :  { %s988_s13 = scalar_lea.hbm %s1320_s3, 2048 }
 0x1bc   :  { %p989_p13 = scmp.ne.s32.totalorder %s1320_s3, %s988_s13  ;;  %p992_p0 = scmp.lt.u32.totalorder %s988_s13, %s1320_s3 }
 0x1be   :  { %p994_p1 = pnand %p992_p0, %p989_p13 }
 0x1c0   :  { %997 = shalt.err (!%p994_p1)
}
 0x1c1   :  { %629 = dma.vmem_to_hbm [thread:$0]  %s624_s9, 2048, %s1320_s3, [#allocation4], %s1003_s22, %s1003_s22, %s1004_s23  }
 0x1c2   :  { %1000 = dma.done.wait [#allocation4], 2048  }
 0x1c3   :  { %1001 = vsyncadd [#allocation4], 4294965248 }
 0x1c4   :  { %633 = vsyncpa [#allocation3], 1 }
 0x1c5   :  { %634 = vsyncpa [#allocation4], 1 }

</bundles_post_ra>
